<compile_context>
chip_gen: v5e
topology: v5e:2x2
jax: 0.10.0
libtpu: 0.0.40
codegen_flags: <defaults>
</compile_context>

<pallas_src>
import functools

import jax
import jax.numpy as jnp
from jax import lax
from jax.experimental import pallas as pl
from jax.experimental.pallas import tpu as pltpu

# ---------------- small config consistent with the module ----------------
B = 2            # batch
S = 8            # sequence length
H = 4            # num_head
D = 32           # head_dim
INNER = H * D    # 128  (lane-dense: exactly one vreg lane width)
EPS = 1e-6
BF16 = jnp.bfloat16


def _round_up(x, m):
    return ((x + m - 1) // m) * m


def rmsnorm_kernel(x_ref, w_ref, o_ref, *, eps, inner):
    # x_ref block: (block_rows, inner) bf16 ; w_ref: (1, inner) bf16
    x = x_ref[...].astype(jnp.float32)                       # f32 compute, as in reference
    ssq = jnp.sum(x * x, axis=1, keepdims=True)               # (rows, 1)
    inv_rms = lax.rsqrt(ssq * (1.0 / inner) + eps)            # mean folded as const-mul
    y = (x * inv_rms) * w_ref[...].astype(jnp.float32)        # weight promoted to f32 (torch promotion)
    o_ref[...] = y.astype(o_ref.dtype)                        # single downcast at the store


def _pick_block_rows(rows, inner, dtype_bytes, *,
                     target_tile_bytes=1 << 20,    # ~1 MiB bf16 tile -> near HBM roofline
                     vmem_budget_bytes=24 << 20,   # resident budget (dbl-buffered in/out + f32 temps)
                     min_grid_steps=2):            # keep both v7x TCs busy
    # Resident VMEM per block row: 2x double-buffered dtype tiles + ~3 f32 temps.
    per_row_resident = inner * (4 * dtype_bytes + 3 * 4)
    cap_vmem = max(8, vmem_budget_bytes // per_row_resident)
    cap_tile = max(8, target_tile_bytes // (inner * dtype_bytes))
    br = min(cap_vmem, cap_tile)
    # Guarantee >= min_grid_steps grid steps whenever the row count allows it.
    br = min(br, max(8, pl.cdiv(rows, min_grid_steps)))
    br = max(8, (br // 8) * 8)                      # sublane alignment
    return min(br, _round_up(rows, 8))


def mistral_rmsnorm(stm, weight, *, eps=EPS, block_rows=None):
    """stm: (B, S, H, D) bf16 ; weight: (H*D,) bf16 -> (B, S, H, D) bf16."""
    b, s, h, d = stm.shape
    inner = h * d
    rows = b * s

    x2 = stm.reshape(rows, inner)          # same flattening the torch module does
    w2 = weight.reshape(1, inner)          # 2-D so it lays out as one lane-dense row
    dtype_bytes = jnp.dtype(stm.dtype).itemsize

    if block_rows is None:
        block_rows = _pick_block_rows(rows, inner, dtype_bytes)
    block_rows = max(8, (block_rows // 8) * 8)

    # Ragged-safe: pad rows up to a multiple of the tile (RMSNorm is row-
    # independent; zero rows are harmless), slice back after the call.
    rows_p = _round_up(rows, block_rows)
    if rows_p != rows:
        x2 = jnp.pad(x2, ((0, rows_p - rows), (0, 0)))
    grid = (rows_p // block_rows,)

    cost = pl.CostEstimate(
        flops=4 * rows * inner,            # square, reduce, scale, weight-mul (rough)
        transcendentals=rows,              # one rsqrt per row
        bytes_accessed=2 * rows * inner * dtype_bytes + inner * dtype_bytes,
    )

    out = pl.pallas_call(
        functools.partial(rmsnorm_kernel, eps=eps, inner=inner),
        out_shape=jax.ShapeDtypeStruct((rows_p, inner), stm.dtype),
        grid_spec=pltpu.PrefetchScalarGridSpec(
            num_scalar_prefetch=0,
            grid=grid,
            in_specs=[
                pl.BlockSpec((block_rows, inner), lambda i: (i, 0)),  # x rows (streamed)
                pl.BlockSpec((1, inner), lambda i: (0, 0)),           # weight (resident)
            ],
            out_specs=pl.BlockSpec((block_rows, inner), lambda i: (i, 0)),
        ),
        compiler_params=pltpu.CompilerParams(
            dimension_semantics=("parallel",),   # rows are independent -> megacore-shardable
            vmem_limit_bytes=32 << 20,           # headroom over the ~10 MiB resident budget
        ),
        cost_estimate=cost,
    )(x2, w2)

    if rows_p != rows:
        out = out[:rows]
    return out.reshape(b, s, h, d)


def rmsnorm_reference(stm, weight, eps=EPS):
    """Pure-JAX mirror of the PyTorch forward, for a correctness check."""
    b, s, h, d = stm.shape
    x = stm.reshape(b * s, h * d).astype(jnp.float32)
    var = jnp.mean(x * x, axis=1, keepdims=True)
    t = x * lax.rsqrt(var + eps)
    y = t * weight.reshape(1, h * d).astype(jnp.float32)
    return y.astype(stm.dtype).reshape(b, s, h, d)


if __name__ == "__main__":
    key = jax.random.PRNGKey(0)
    kx, kw = jax.random.split(key)

    stm = (0.1 * jax.random.normal(kx, (B, S, H, D), jnp.float32)).astype(BF16)
    weight = (1.0 + 0.02 * jax.random.normal(kw, (INNER,), jnp.float32)).astype(BF16)

    y = mistral_rmsnorm(stm, weight)
    jax.block_until_ready(y)

    assert y.shape == (B, S, H, D) and y.dtype == BF16
    y_ref = rmsnorm_reference(stm, weight)
    assert jnp.allclose(y.astype(jnp.float32), y_ref.astype(jnp.float32),
                        atol=2e-2, rtol=2e-2), "mismatch vs reference"
    print("KERNEL_OK")
</pallas_src>

<mosaic_0001>
module attributes {stable_mosaic.version = 11 : i64} {
  func.func @rmsnorm_kernel(%arg0: i32, %arg1: memref<8x128xbf16, #tpu.memory_space<vmem>>, %arg2: memref<1x128xbf16, #tpu.memory_space<vmem>>, %arg3: memref<8x128xbf16, #tpu.memory_space<vmem>>) attributes {dimension_semantics = [#tpu.dimension_semantics<parallel>], iteration_bounds = array<i64: 2>, scalar_prefetch = 0 : i64, scratch_operands = 0 : i64, tpu.core_type = #tpu.core_type<tc>, window_params = [{transform_indices = @transform_0, window_bounds = array<i64: 8, 128>}, {pipeline_mode = #tpu.pipeline_mode<synchronous>, transform_indices = @transform_1, window_bounds = array<i64: 1, 128>}, {transform_indices = @transform_2, window_bounds = array<i64: 8, 128>}]} {
    %c0 = arith.constant 0 : index
    %c0_0 = arith.constant 0 : index
    %0 = vector.load %arg1[%c0, %c0_0] : memref<8x128xbf16, #tpu.memory_space<vmem>>, vector<8x128xbf16>
    %1 = arith.extf %0 : vector<8x128xbf16> to vector<8x128xf32>
    %2 = arith.mulf %1, %1 : vector<8x128xf32>
    %cst = arith.constant dense<0.000000e+00> : vector<8xf32>
    %3 = vector.multi_reduction <add>, %2, %cst [1] : vector<8x128xf32> to vector<8xf32>
    %4 = vector.shape_cast %3 : vector<8xf32> to vector<8x1xf32>
    %cst_1 = arith.constant 7.812500e-03 : f32
    %5 = vector.broadcast %cst_1 : f32 to vector<8x1xf32>
    %6 = arith.mulf %4, %5 : vector<8x1xf32>
    %cst_2 = arith.constant 9.99999997E-7 : f32
    %7 = vector.broadcast %cst_2 : f32 to vector<8x1xf32>
    %8 = arith.addf %6, %7 : vector<8x1xf32>
    %9 = math.rsqrt %8 : vector<8x1xf32>
    %10 = vector.broadcast %9 : vector<8x1xf32> to vector<8x128xf32>
    %11 = arith.mulf %1, %10 : vector<8x128xf32>
    %c0_3 = arith.constant 0 : index
    %c0_4 = arith.constant 0 : index
    %12 = vector.load %arg2[%c0_3, %c0_4] : memref<1x128xbf16, #tpu.memory_space<vmem>>, vector<1x128xbf16>
    %13 = arith.extf %12 : vector<1x128xbf16> to vector<1x128xf32>
    %14 = vector.broadcast %13 : vector<1x128xf32> to vector<8x128xf32>
    %15 = arith.mulf %11, %14 : vector<8x128xf32>
    %16 = arith.truncf %15 : vector<8x128xf32> to vector<8x128xbf16>
    %c0_5 = arith.constant 0 : index
    %c0_6 = arith.constant 0 : index
    %17 = vector.load %arg3[%c0_5, %c0_6] : memref<8x128xbf16, #tpu.memory_space<vmem>>, vector<8x128xbf16>
    tpu.vector_store %arg3[%c0_5, %c0_6], %16 {strides = array<i32>} : memref<8x128xbf16, #tpu.memory_space<vmem>>, vector<8x128xbf16>,
    return
  }
  func.func @transform_0(%arg0: i32) -> (i32, i32) {
    %c0_i32 = arith.constant 0 : i32
    %c0_i32_0 = arith.constant 0 : i32
    return %arg0, %c0_i32 : i32, i32
  }
  func.func @transform_1(%arg0: i32) -> (i32, i32) {
    %c0_i32 = arith.constant 0 : i32
    %c0_i32_0 = arith.constant 0 : i32
    %c0_i32_1 = arith.constant 0 : i32
    return %c0_i32, %c0_i32_0 : i32, i32
  }
  func.func @transform_2(%arg0: i32) -> (i32, i32) {
    %c0_i32 = arith.constant 0 : i32
    %c0_i32_0 = arith.constant 0 : i32
    return %arg0, %c0_i32 : i32, i32
  }
}

</mosaic_0001>

<bundles_post_ra>
// kernel: tpu_custom_call.1
= control target key start
LH: loop header
LB: loop body
LE: loop exit
PB: predicated region body
PF: predicated region fallthrough
CT: control target
= control target key end

     0   :  { %7 = vsyncpa [#allocation3], 0  ;;  %s659_s0 = inlined_call_operand.hbm [shape: bf16[16,128], index: 0, kind: input, shape index: {}]   ;;  %s660_s1 = inlined_call_operand.hbm [shape: bf16[1,128], index: 1, kind: input, shape index: {}]   ;;  %s661_s2 = inlined_call_operand.hbm [shape: bf16[16,128], index: 2, kind: output, shape index: {}]  }
   0x1   :  { %9 = vsyncpa [#allocation3 + $0x1], 0 }
   0x2   :  { %10 = vsyncpa [#allocation6], 0 }
   0x3   :  { %11 = vsyncpa [#allocation4], 0 }
   0x4   :  { %13 = vsyncpa [#allocation4 + $0x1], 0  ;;  %s517_s9 = smov 0   ;;  %s519_s10 = smov 0  }
   0x5   :  { %s521_s11 = smov 0   ;;  %s523_s12 = smov 0  }
   0x6 LB: > { %s538_s13 = sadd.s32 4294967295, %s499_s12   ;;  %s296_s14 = sadd.s32 4294967294, %s499_s12   ;;  %s499_s12 = sphi %s523_s12, %s671_s12   ;;  %s495_s11 = sphi %s521_s11, %s670_s11   ;;  %s491_s10 = sphi %s519_s10, %s669_s10   ;;  %s487_s9 = sphi %s517_s9, %s668_s9  }
   0x7   : > { %p39_p0 = scmp.ne.s32.totalorder %s491_s10, %s487_s9  ;;  %p40_p1 = scmp.eq.s32.totalorder %s538_s13, 0 }
   0x8   : > { %p84_p2 = scmp.eq.s32.totalorder %s538_s13, 1  ;;  %p90_p3 = scmp.eq.s32.totalorder %s296_s14, 1 }
   0x9   : > { %p547_p4 = por %p40_p1, %p39_p0  ;;  %p297_p5 = scmp.ge.s32.totalorder %s499_s12, 1 }
   0xa   : > { %p552_p6 = por %p90_p3, %p39_p0  ;;  %p97_p7 = scmp.lt.s32.totalorder %s499_s12, 3 }
   0xb   : > { %s109_s19 = sshll.u32 %s660_s1, 4  ;;  %s501_s21 = smov [#allocation5]   ;;  %s110_s19 = int_to_ptr.hbm [resolvable:$true] %s109_s19 }
   0xc   : > { %p560_p8 = pnand %p297_p5, %p97_p7  ;;  %s111_s22 = sshll.u32 %s501_s21, 4  ;;  %s112_s22 = int_to_ptr.vmem [resolvable:$true] %s111_s22 }
   0xd   : > { %s570_s23 = sadd.s32 1, %s499_s12   ;;  %s26_s24 = sadd.s32 1, %s495_s11 }
   0xe   : > { %p318_p10 = pneg %p560_p8  ;;  %s23_s25 = ssub.s32 %s499_s12, %s570_s23 }
   0xf   : > { %p24_p12 = scmp.eq.s32.totalorder %s23_s25, 0  ;;  %p33_p13 = scmp.ne.s32.totalorder %s495_s11, %s491_s10 }
  0x10   : > { %p319_p11 = pnand %p318_p10, %p40_p1  ;;  %p34_p0 = scmp.eq.s32.totalorder %s499_s12, 0 }
  0x11   : > { %s579_s26 = scalar_select %p24_p12, %s495_s11, %s26_s24  }
  0x12   : > { %321 = dma.hbm_to_vmem [thread:$0]  (!%p319_p11), %s110_s19, 16, %s112_s22, [#allocation6]  }
  0x13   : > { %p583_p3 = por %p84_p2, %p33_p13  ;;  %p331_p5 = scmp.lt.s32.totalorder %s499_s12, 2 }
  0x14   : > { %s122_s28 = sand.u32 1, %s495_s11   ;;  %s301_s29 = sshll.u32 %s499_s12, 2 }
  0x15   : > { %p35_p7 = por %p34_p0, %p33_p13  ;;  %s300_s30 = sshll.u32 %s122_s28, 2 }
  0x16   : > { %s130_s5 = scalar_lea.hbm %s659_s0, %s301_s29  ;;  %s126_s7 = scalar_lea.vmem [#allocation2], %s300_s30 }
  0x17   : > { %s132_s6 = sshll.u32 %s130_s5, 4  ;;  %s134_s8 = sshll.u32 %s126_s7, 4  ;;  %s133_s6 = int_to_ptr.hbm [resolvable:$true] %s132_s6  ;;  %s135_s8 = int_to_ptr.vmem [resolvable:$true] %s134_s8 }
  0x18   : > { %p593_p10 = pnand %p331_p5, %p35_p7  ;;  %s123_s17 = scalar_lea.sflag [#allocation3], %s122_s28 }
  0x19   : > { %s399_s18 = sshra.s32 %s133_s6, 4  ;;  %s406_s24 = scalar_lea.hbm %s659_s0, 8  ;;  %s400_s18 = int_to_ptr.hbm [resolvable:$true] %s399_s18 }
  0x1a   : > { %s401_s19 = scalar_lea.hbm %s400_s18, 4  ;;  %p403_p11 = pneg %p593_p10 }
  0x1b   : > { %p402_p2 = scmp.ne.s32.totalorder %s400_s18, %s401_s19  ;;  %p407_p0 = scmp.lt.s32.totalorder %s400_s18, %s659_s0 }
  0x1c   : > { %p408_p5 = scmp.lt.s32.totalorder %s406_s24, %s401_s19 }
  0x1d   : > { %p404_p12 = pnand %p403_p11, %p402_p2 }
  0x1e   : > { %p409_p7 = por %p408_p5, %p407_p0 }
  0x1f   : > { %p405_p13 = pneg %p404_p12 }
  0x21   : > { %p410_p9 = pnand %p409_p7, %p405_p13 }
  0x23   : > { %413 = shalt.err (!%p410_p9)
}
  0x24   : > { %325 = dma.hbm_to_vmem [thread:$0]  (!%p593_p10), %s133_s6, 64, %s135_s8, %s123_s17  }
  0x25   : > { %143 = sbr.rel (%p560_p8) target bundleno = 197 (0xc5), region = 28  ;;  %s610_s28 = sand.u32 (!%p560_p8), 1, %s491_s10  }
  0x26   : > { %s303_s30 = sshll.u32 (!%p560_p8), %s610_s28, 2  ;;  %s146_s3 = scalar_lea.sflag (!%p560_p8), [#allocation3], %s610_s28 }
  0x27   : > { %s149_s4 = scalar_lea.vmem (!%p560_p8), [#allocation2], %s303_s30 }
  0x2a   : > { %474 = dma.done.wait (%p547_p4), %s146_s3, 64  }
  0x2b   : > { %476 = vsyncadd (%p547_p4), %s146_s3, 4294967232 }
  0x2c   : > { %478 = dma.done.wait (%p40_p1), [#allocation6], 16  }
  0x2d   : > { %480 = vsyncadd (%p40_p1), [#allocation6], 4294967280  ;;  %v176_v0 = vld [vmem:[%s149_s4] sm:$0xf]  ;;  %v194_v9 = vld [vmem:[#allocation5] sm:$0x1] }
  0x2e   : > { %v177_v1 = vunpack.c.l.bf16 %v176_v0  ;;  %v195_v11 = vunpack.c.l.bf16 %v194_v9  ;;  %s307_s15 = sshll.u32 %s538_s13, 2  ;;  %s175_s7 = scalar_lea.vmem [#allocation7], %s303_s30 }
  0x2f   : > { %s211_s6 = scalar_lea.hbm %s661_s2, %s307_s15  ;;  %s213_s8 = sshll.u32 %s175_s7, 4  ;;  %s214_s8 = int_to_ptr.vmem [resolvable:$true] %s213_s8 }
  0x30   : > { %v178_v2 = vmul.f32 %v177_v1, %v177_v1  ;;  %v196_v14 = vperm.slane %v195_v11, 0  ;;  %s215_s14 = sshll.u32 %s211_s6, 4  ;;  %s201_s13 = scalar_lea.sflag [#allocation4], %s610_s28  ;;  %s216_s14 = int_to_ptr.hbm [resolvable:$true] %s215_s14 }
  0x31   : > { %s443_s17 = sshra.s32 %s216_s14, 4  ;;  %s449_s22 = scalar_lea.hbm %s661_s2, 8  ;;  %s444_s17 = int_to_ptr.hbm [resolvable:$true] %s443_s17 }
  0x32   : > { %179 = vadd.xlane.f32.xlu0 %v178_v2  ;;  %s445_s18 = scalar_lea.hbm %s444_s17, 4  ;;  %p450_p9 = scmp.lt.s32.totalorder %s444_s17, %s661_s2 }
  0x33   : > { %p446_p1 = scmp.ne.s32.totalorder %s444_s17, %s445_s18  ;;  %p451_p10 = scmp.lt.s32.totalorder %s449_s22, %s445_s18 }
  0x35   : > { %p447_p4 = pnand %p446_p1, %p583_p3  ;;  %p452_p2 = por %p451_p10, %p450_p9 }
  0x37   : > { %p448_p8 = pneg %p447_p4 }
  0x39   : > { %p453_p11 = pnand %p452_p2, %p448_p8 }
  0xa5   : > { %v180_v3 = vpop.xlane.xlu0 %179 }
  0xa6   : > { %v181_v4 = vmul.f32 0.0078125, %v180_v3 }
  0xa8   : > { %v182_v5 = vadd.f32 1e-06, %v181_v4 }
  0xaa   : > { %367 = vrsqrt.f32 %v182_v5  ;;  %vm189_vm1 = vweird.f32 %v182_v5 }
  0xb0   : > { %v368_v6 = vpop.eup %367 }
  0xb1   : > { %v184_v7 = vmul.f32 %v368_v6, %v182_v5  ;;  %vm190_vm0 = vweird.f32 %v368_v6 }
  0xb2   : > { %vm191_vm2 = vmor %vm189_vm1, %vm190_vm0 }
  0xb3   : > { %v185_v8 = vmul.f32 %v368_v6, %v184_v7 }
  0xb5   : > { %v186_v10 = vmul.f32 0.5, %v185_v8 }
  0xb7   : > { %v187_v12 = vsub.f32 1.5, %v186_v10 }
  0xb9   : > { %v188_v13 = vmul.f32 %v368_v6, %v187_v12 }
  0xbb   : > { %v192_v15 = vsel %vm191_vm2, %v368_v6, %v188_v13 }
  0xbc   : > { %v193_v16 = vmul.f32 %v192_v15, %v177_v1 }
  0xbe   : > { %v197_v17 = vmul.f32 %v196_v14, %v193_v16 }
  0xc0   : > { %v198_v18 = vpack.c.bf16 %v197_v17, %v197_v17 }
  0xc2   : > { %199 = vst [vmem:[%s175_s7] sm:$0xf] %v198_v18 }
  0xc3   : > { %456 = shalt.err (!%p453_p11)
}
  0xc4   : > { %316 = dma.vmem_to_hbm [thread:$0]  (%p583_p3), %s214_s8, 64, %s216_s14, %s201_s13  }
  0xc5 PF: > { %s227_s29 = sand.u32 1, %s487_s9   ;;  %p667_p12 = scmp.ge.s32.totalorder %s499_s12, 2 }
  0xc6   : > { %s228_s28 = scalar_lea.sflag [#allocation4], %s227_s29 }
  0xc7   : > { %p327_p13 = pnand %p667_p12, %p552_p6 }
  0xc9   : > { %p328_p0 = pneg %p327_p13 }
  0xcb   : > { %482 = dma.done.wait (%p328_p0), %s228_s28, 64  }
  0xcc   : > { %484 = vsyncadd (%p328_p0), %s228_s28, 4294967232  ;;  %p16_p5 = scmp.ge.s32.totalorder %s570_s23, 4   ;;  %s668_s9 = smov %s491_s10 }
  0xcd   : > { %s669_s10 = smov %s495_s11  ;;  %s670_s11 = smov %s579_s26 }
  0xce   : > { %s671_s12 = smov %s570_s23  ;;  %18 = sbr.rel (!%p16_p5) target bundleno = 6 (0x6), region = 77 }
  0xd3   :  { %234 = vsyncpa [#allocation3], 1 }
  0xd4   :  { %236 = vsyncpa [#allocation3 + $0x1], 1 }
  0xd5   :  { %237 = vsyncpa [#allocation6], 1 }
  0xd6   :  { %238 = vsyncpa [#allocation4], 1 }
  0xd7   :  { %240 = vsyncpa [#allocation4 + $0x1], 1 }

</bundles_post_ra>
